<compile_context>
chip_gen: v5e
topology: v5e:2x2
jax: 0.10.0
libtpu: 0.0.40
codegen_flags: <defaults>
</compile_context>

<pallas_src>
import functools

import jax
import jax.numpy as jnp
from jax.experimental import pallas as pl
from jax.experimental.pallas import tpu as pltpu


def _round_up(v, m):
    return ((v + m - 1) // m) * m


def _modulating_factor(one_minus_pt, gamma):
    """(1 - p_t) ** gamma, avoiding float pow for small integer gamma."""
    g = float(gamma)
    if g == 0.0:
        return jnp.ones_like(one_minus_pt)
    if g.is_integer() and 1 <= int(g) <= 4:
        r = one_minus_pt
        for _ in range(int(g) - 1):
            r = r * one_minus_pt
        return r
    return jnp.power(one_minus_pt, g)  # fallback: EUP-heavy, rarely used


def _focal_terms(x_raw, t_raw, alpha, gamma):
    x = x_raw.astype(jnp.float32)
    t = t_raw.astype(jnp.float32)
    # Numerically stable BCE with logits (matches F.binary_cross_entropy_with_logits):
    #   ce = max(x, 0) - x*t + log(1 + exp(-|x|))
    ce = jnp.maximum(x, 0.0) - x * t + jnp.log1p(jnp.exp(-jnp.abs(x)))
    p_t = jnp.exp(-ce)
    return alpha * _modulating_factor(1.0 - p_t, gamma) * ce


def _focal_partial_sum_kernel(x_ref, t_ref, out_ref, *, alpha, gamma, total,
                              tile_r, mask_tail):
    focal = _focal_terms(x_ref[...], t_ref[...], alpha, gamma)  # (tile_r, 128) f32
    if mask_tail:  # static flag: only emitted when padding exists
        i = pl.program_id(0)
        row = jax.lax.broadcasted_iota(jnp.int32, (tile_r, 128), 0)
        lane = jax.lax.broadcasted_iota(jnp.int32, (tile_r, 128), 1)
        flat = (i * tile_r + row) * 128 + lane
        focal = jnp.where(flat < total, focal, 0.0)
    # Fold to an (8, 128) partial (pure VPU adds) and store it lane-dense.
    out_ref[...] = jnp.sum(focal.reshape(tile_r // 8, 8, 128), axis=0)


def _focal_elementwise_kernel(x_ref, t_ref, out_ref, *, alpha, gamma):
    out_ref[...] = _focal_terms(x_ref[...], t_ref[...], alpha, gamma).astype(out_ref.dtype)


def focal_loss(inputs, targets, *, alpha=0.25, gamma=2.0, reduction="mean",
               tile_rows=2048):
    """Pallas implementation of FocalLoss.forward."""
    alpha = float(alpha)
    gamma = float(gamma)
    C = inputs.shape[-1]

    if C != 1 and targets.ndim == 1:
        # int class indices -> int8 one-hot stream (4x fewer HBM bytes than f32)
        t_full = jax.nn.one_hot(targets, C, dtype=jnp.int8)
    else:
        # Dense (float) targets, or the C == 1 sigmoid + plain-BCE branch, which
        # is equivalent to the with-logits formula.
        # TODO(synk): PyTorch's F.binary_cross_entropy clamps log terms at -100;
        # this only differs from the logits formula for |logit| > ~100.
        t_full = targets.astype(jnp.float32)

    x_flat = inputs.reshape(-1)
    t_flat = t_full.reshape(-1)
    if x_flat.shape[0] != t_flat.shape[0]:
        raise ValueError("inputs and targets have incompatible shapes")

    total = x_flat.shape[0]
    n_rows = -(-total // 128)
    # Tile rows: multiple of 32 (int8 sublane tiling), capped so each f32 input
    # buffer is ~1 MiB -> kernel is DMA/compute bound, not per-step bound.
    tile_r = min(int(tile_rows), _round_up(n_rows, 32))
    tile_r = _round_up(max(tile_r, 32), 32)
    num_tiles = -(-n_rows // tile_r)
    padded_rows = num_tiles * tile_r
    pad = padded_rows * 128 - total

    x2 = jnp.pad(x_flat, (0, pad)).reshape(padded_rows, 128)
    t2 = jnp.pad(t_flat, (0, pad)).reshape(padded_rows, 128)

    compiler_params = pltpu.CompilerParams(
        dimension_semantics=("parallel",),      # v7x: shard grid across 2 TCs
        vmem_limit_bytes=32 * 1024 * 1024,      # headroom on v5e's 16 MiB default
    )

    if reduction in ("mean", "sum"):
        kernel = functools.partial(
            _focal_partial_sum_kernel, alpha=alpha, gamma=gamma, total=total,
            tile_r=tile_r, mask_tail=(pad > 0))
        partials = pl.pallas_call(
            kernel,
            out_shape=jax.ShapeDtypeStruct((num_tiles * 8, 128), jnp.float32),
            grid_spec=pltpu.PrefetchScalarGridSpec(
                num_scalar_prefetch=0,
                grid=(num_tiles,),
                in_specs=[
                    pl.BlockSpec((tile_r, 128), lambda i: (i, 0)),
                    pl.BlockSpec((tile_r, 128), lambda i: (i, 0)),
                ],
                out_specs=pl.BlockSpec((8, 128), lambda i: (i, 0)),
            ),
            compiler_params=compiler_params,
        )(x2, t2)
        s = jnp.sum(partials)
        if reduction == "mean":
            return s / jnp.float32(total)
        return s

    if reduction == "none":
        kernel = functools.partial(_focal_elementwise_kernel, alpha=alpha, gamma=gamma)
        out = pl.pallas_call(
            kernel,
            out_shape=jax.ShapeDtypeStruct((padded_rows, 128), jnp.float32),
            grid_spec=pltpu.PrefetchScalarGridSpec(
                num_scalar_prefetch=0,
                grid=(num_tiles,),
                in_specs=[
                    pl.BlockSpec((tile_r, 128), lambda i: (i, 0)),
                    pl.BlockSpec((tile_r, 128), lambda i: (i, 0)),
                ],
                out_specs=pl.BlockSpec((tile_r, 128), lambda i: (i, 0)),
            ),
            compiler_params=compiler_params,
        )(x2, t2)
        return out.reshape(-1)[:total].reshape(inputs.shape)

    raise ValueError(f"unknown reduction: {reduction!r}")


def _focal_loss_ref(inputs, targets, alpha=0.25, gamma=2.0, reduction="mean"):
    if inputs.shape[-1] != 1 and targets.ndim == 1:
        t = jax.nn.one_hot(targets, inputs.shape[-1], dtype=jnp.float32)
    else:
        t = targets.astype(jnp.float32)
    x = inputs.astype(jnp.float32)
    ce = jnp.maximum(x, 0.0) - x * t + jnp.log1p(jnp.exp(-jnp.abs(x)))
    p_t = jnp.exp(-ce)
    fl = alpha * (1.0 - p_t) ** gamma * ce
    if reduction == "mean":
        return fl.mean()
    if reduction == "sum":
        return fl.sum()
    return fl


if __name__ == "__main__":
    key = jax.random.PRNGKey(0)
    k1, k2, k3, k4 = jax.random.split(key, 4)

    # Small shapes consistent with the module: N rows of C-class logits.
    N, C = 16, 8
    x = jax.random.normal(k1, (N, C), dtype=jnp.float32) * 2.0
    t = jax.random.randint(k2, (N,), 0, C, dtype=jnp.int32)

    out_mean = jax.block_until_ready(focal_loss(x, t, reduction="mean"))
    ref_mean = _focal_loss_ref(x, t, reduction="mean")
    assert jnp.allclose(out_mean, ref_mean, rtol=1e-5, atol=1e-6), (out_mean, ref_mean)

    out_sum = jax.block_until_ready(focal_loss(x, t, reduction="sum"))
    ref_sum = _focal_loss_ref(x, t, reduction="sum")
    assert jnp.allclose(out_sum, ref_sum, rtol=1e-5, atol=1e-5), (out_sum, ref_sum)

    out_none = jax.block_until_ready(focal_loss(x, t, reduction="none"))
    ref_none = _focal_loss_ref(x, t, reduction="none")
    assert out_none.shape == (N, C)
    assert jnp.allclose(out_none, ref_none, rtol=1e-5, atol=1e-6)

    # Multi-tile + tail-masking + "parallel"-grid path (force a small tile).
    N2, C2 = 700, 8
    x2 = jax.random.normal(k3, (N2, C2), dtype=jnp.float32) * 2.0
    t2 = jax.random.randint(k4, (N2,), 0, C2, dtype=jnp.int32)
    out2 = jax.block_until_ready(focal_loss(x2, t2, reduction="mean", tile_rows=32))
    ref2 = _focal_loss_ref(x2, t2, reduction="mean")
    assert jnp.allclose(out2, ref2, rtol=1e-5, atol=1e-6), (out2, ref2)

    print("KERNEL_OK")
</pallas_src>

<mosaic_0001>
module attributes {stable_mosaic.version = 11 : i64} {
  func.func @_focal_partial_sum_kernel(%arg0: i32, %arg1: memref<32x128xf32, #tpu.memory_space<vmem>>, %arg2: memref<32x128xi8, #tpu.memory_space<vmem>>, %arg3: memref<8x128xf32, #tpu.memory_space<vmem>>) attributes {dimension_semantics = [#tpu.dimension_semantics<parallel>], iteration_bounds = array<i64: 1>, scalar_prefetch = 0 : i64, scratch_operands = 0 : i64, tpu.core_type = #tpu.core_type<tc>, window_params = [{transform_indices = @transform_0, window_bounds = array<i64: 32, 128>}, {transform_indices = @transform_1, window_bounds = array<i64: 32, 128>}, {transform_indices = @transform_2, window_bounds = array<i64: 8, 128>}]} {
    %c0 = arith.constant 0 : index
    %c0_0 = arith.constant 0 : index
    %0 = vector.load %arg1[%c0, %c0_0] : memref<32x128xf32, #tpu.memory_space<vmem>>, vector<32x128xf32>
    %c0_1 = arith.constant 0 : index
    %c0_2 = arith.constant 0 : index
    %1 = vector.load %arg2[%c0_1, %c0_2] : memref<32x128xi8, #tpu.memory_space<vmem>>, vector<32x128xi8>
    %2 = arith.sitofp %1 : vector<32x128xi8> to vector<32x128xf32>
    %cst = arith.constant 0.000000e+00 : f32
    %3 = vector.broadcast %cst : f32 to vector<32x128xf32>
    %4 = arith.maximumf %0, %3 : vector<32x128xf32>
    %5 = arith.mulf %0, %2 : vector<32x128xf32>
    %6 = arith.subf %4, %5 : vector<32x128xf32>
    %7 = math.absf %0 : vector<32x128xf32>
    %cst_3 = arith.constant 0.000000e+00 : f32
    %8 = vector.broadcast %cst_3 : f32 to vector<32x128xf32>
    %9 = arith.subf %8, %7 : vector<32x128xf32>
    %10 = math.exp %9 : vector<32x128xf32>
    %11 = math.log1p %10 : vector<32x128xf32>
    %12 = arith.addf %6, %11 : vector<32x128xf32>
    %cst_4 = arith.constant 0.000000e+00 : f32
    %13 = vector.broadcast %cst_4 : f32 to vector<32x128xf32>
    %14 = arith.subf %13, %12 : vector<32x128xf32>
    %15 = math.exp %14 : vector<32x128xf32>
    %cst_5 = arith.constant 1.000000e+00 : f32
    %16 = vector.broadcast %cst_5 : f32 to vector<32x128xf32>
    %17 = arith.subf %16, %15 : vector<32x128xf32>
    %18 = arith.mulf %17, %17 : vector<32x128xf32>
    %cst_6 = arith.constant 2.500000e-01 : f32
    %19 = vector.broadcast %cst_6 : f32 to vector<32x128xf32>
    %20 = arith.mulf %19, %18 : vector<32x128xf32>
    %21 = arith.mulf %20, %12 : vector<32x128xf32>
    %22 = tpu.iota {dimensions = array<i32: 0>} : vector<32x128xi32>
    %23 = tpu.iota {dimensions = array<i32: 1>} : vector<32x128xi32>
    %c32_i32 = arith.constant 32 : i32
    %24 = arith.muli %arg0, %c32_i32 : i32
    %25 = vector.broadcast %24 : i32 to vector<32x128xi32>
    %26 = arith.addi %25, %22 : vector<32x128xi32>
    %c128_i32 = arith.constant 128 : i32
    %27 = vector.broadcast %c128_i32 : i32 to vector<32x128xi32>
    %28 = arith.muli %26, %27 : vector<32x128xi32>
    %29 = arith.addi %28, %23 : vector<32x128xi32>
    %c128_i32_7 = arith.constant 128 : i32
    %30 = vector.broadcast %c128_i32_7 : i32 to vector<32x128xi32>
    %31 = arith.cmpi slt, %29, %30 : vector<32x128xi32>
    %cst_8 = arith.constant 0.000000e+00 : f32
    %32 = vector.broadcast %cst_8 : f32 to vector<32x128xf32>
    %33 = arith.select %31, %21, %32 : vector<32x128xi1>, vector<32x128xf32>
    %34 = vector.shape_cast %33 : vector<32x128xf32> to vector<4x8x128xf32>
    %cst_9 = arith.constant dense<0.000000e+00> : vector<8x128xf32>
    %35 = vector.multi_reduction <add>, %34, %cst_9 [0] : vector<4x8x128xf32> to vector<8x128xf32>
    %c0_10 = arith.constant 0 : index
    %c0_11 = arith.constant 0 : index
    %36 = vector.load %arg3[%c0_10, %c0_11] : memref<8x128xf32, #tpu.memory_space<vmem>>, vector<8x128xf32>
    tpu.vector_store %arg3[%c0_10, %c0_11], %35 {strides = array<i32>} : memref<8x128xf32, #tpu.memory_space<vmem>>, vector<8x128xf32>,
    return
  }
  func.func @transform_0(%arg0: i32) -> (i32, i32) {
    %c0_i32 = arith.constant 0 : i32
    %c0_i32_0 = arith.constant 0 : i32
    return %arg0, %c0_i32 : i32, i32
  }
  func.func @transform_1(%arg0: i32) -> (i32, i32) {
    %c0_i32 = arith.constant 0 : i32
    %c0_i32_0 = arith.constant 0 : i32
    return %arg0, %c0_i32 : i32, i32
  }
  func.func @transform_2(%arg0: i32) -> (i32, i32) {
    %c0_i32 = arith.constant 0 : i32
    %c0_i32_0 = arith.constant 0 : i32
    return %arg0, %c0_i32 : i32, i32
  }
}

</mosaic_0001>

<bundles_post_ra>
// kernel: tpu_custom_call.1
= control target key start
LH: loop header
LB: loop body
LE: loop exit
PB: predicated region body
PF: predicated region fallthrough
CT: control target
= control target key end

     0   :  { %7 = vsyncpa [#allocation3], 0  ;;  %s370_s0 = inlined_call_operand.hbm [shape: f32[32,128], index: 0, kind: input, shape index: {}]   ;;  %s371_s1 = inlined_call_operand.hbm [shape: s8[32,128], index: 1, kind: input, shape index: {}]   ;;  %s372_s2 = inlined_call_operand.hbm [shape: f32[8,128], index: 2, kind: output, shape index: {}]  }
   0x1   :  { %8 = vsyncpa [#allocation6], 0 }
   0x2   :  { %9 = vsyncpa [#allocation4], 0  ;;  %s14_s11 = sshll.u32 %s370_s0, 4  ;;  %s309_s12 = smov [#allocation2]   ;;  %s15_s11 = int_to_ptr.hbm [resolvable:$true] %s14_s11 }
   0x3   :  { %s16_s13 = sshll.u32 %s309_s12, 4  ;;  %s28_s16 = sshll.u32 %s371_s1, 4  ;;  %s17_s13 = int_to_ptr.vmem [resolvable:$true] %s16_s13  ;;  %s29_s16 = int_to_ptr.hbm [resolvable:$true] %s28_s16 }
   0x4   :  { %s310_s17 = smov 128   ;;  %s311_s18 = smov 8  }
   0x5   :  { %22 = dma.hbm_to_vmem [thread:$0]  %s15_s11, 512, %s17_s13, [#allocation3], %s310_s17, %s310_s17, %s311_s18  }
   0x6   :  { %s312_s19 = smov [#allocation5]  }
   0x7   :  { %s30_s20 = sshll.u32 %s312_s19, 4  ;;  %s31_s20 = int_to_ptr.vmem [resolvable:$true] %s30_s20 }
   0x8   :  { %33 = dma.hbm_to_vmem [thread:$0]  %s29_s16, 128, %s31_s20, [#allocation6]  }
   0x9   :  { %303 = dma.done.wait [#allocation3], 512  }
   0xa   :  { %304 = vsyncadd [#allocation3], 4294966784 }
   0xb   :  { %305 = dma.done.wait [#allocation6], 128  }
   0xc   :  { %306 = vsyncadd [#allocation6], 4294967168  ;;  %v335_v0 = vld [vmem:[#allocation2] sm:$0xff]  ;;  %v337_v1 = vld [vmem:[#allocation2 + $0x8] sm:$0xff]  ;;  %s313_s0 = smov [#allocation7]   ;;  %s191_s23 = sshll.u32 %s372_s2, 4  ;;  %s192_s23 = int_to_ptr.hbm [resolvable:$true] %s191_s23 }
   0xd   :  { %v339_v2 = vld [vmem:[#allocation2 + $0x10] sm:$0xff]  ;;  %v341_v3 = vld [vmem:[#allocation2 + $0x18] sm:$0xff]  ;;  %v67_v4 = vand.u32 2147483647, %v335_v0  ;;  %v68_v5 = vand.u32 2147483647, %v337_v1 }
   0xe   :  { %v69_v6 = vand.u32 2147483647, %v339_v2  ;;  %v70_v7 = vand.u32 2147483647, %v341_v3  ;;  %v46_v14 = vld [vmem:[#allocation5] sm:$0xff]  ;;  %v55_v24 = vmax.f32 %v335_v0, 0.0 }
   0xf   :  { %v71_v8 = vsub.f32 0.0, %v67_v4  ;;  %v72_v9 = vsub.f32 0.0, %v68_v5  ;;  %v47_v17 = vunpack.c.0.s8 %v46_v14  ;;  %v48_v18 = vunpack.c.1.s8 %v46_v14  ;;  %s189_s1 = sshll.u32 %s313_s0, 4  ;;  %s190_s1 = int_to_ptr.vmem [resolvable:$true] %s189_s1 }
  0x10   :  { %v73_v10 = vsub.f32 0.0, %v69_v6  ;;  %v74_v11 = vsub.f32 0.0, %v70_v7  ;;  %v49_v19 = vunpack.c.2.s8 %v46_v14  ;;  %v50_v20 = vunpack.c.3.s8 %v46_v14 }
  0x11   :  { %v75_v12 = vmul.f32 1.442695, %v71_v8  ;;  %v77_v13 = vmul.f32 1.442695, %v72_v9  ;;  %v51_v22 = vcvt.s32.f32 %v47_v17  ;;  %v52_v28 = vcvt.s32.f32 %v48_v18 }
  0x12   :  { %v79_v15 = vmul.f32 1.442695, %v73_v10  ;;  %v81_v16 = vmul.f32 1.442695, %v74_v11  ;;  %v56_v29 = vmax.f32 %v337_v1, 0.0  ;;  %v53_v33 = vcvt.s32.f32 %v49_v19 }
  0x13   :  { %207 = vpow2.f32 %v75_v12  ;;  %v54_v34 = vcvt.s32.f32 %v50_v20  ;;  %v59_v36 = vmul.f32 %v51_v22, %v335_v0  ;;  %v60_v42 = vmul.f32 %v52_v28, %v337_v1 }
  0x14   :  { %209 = vpow2.f32 %v77_v13  ;;  %v57_v46 = vmax.f32 %v339_v2, 0.0  ;;  %v61_v47 = vmul.f32 %v53_v33, %v339_v2  ;;  %v58_v49 = vmax.f32 %v341_v3, 0.0 }
  0x15   :  { %211 = vpow2.f32 %v79_v15  ;;  %v62_v50 = vmul.f32 %v54_v34, %v341_v3  ;;  %v63_v54 = vsub.f32 %v55_v24, %v59_v36  ;;  %v64_v59 = vsub.f32 %v56_v29, %v60_v42 }
  0x16   :  { %213 = vpow2.f32 %v81_v16  ;;  %v65_v0 = vsub.f32 %v57_v46, %v61_v47  ;;  %v151_v5 = vlaneseq }
  0x17   :  { %v66_v7 = vsub.f32 %v58_v49, %v62_v50 }
  0x18   :  { %v152_v17 = vshrl.u32 %v151_v5, 7  ;;  %v157_v28 = vand.u32 127, %v151_v5 }
  0x19   :  { %v208_v21 = vpop.eup %207 }
  0x1a   :  { %v210_v23 = vpop.eup %209  ;;  %v83_v25 = vadd.f32 1.0, %v208_v21  ;;  %v86_v26 = vmul.f32 -0.5, %v208_v21  ;;  %v89_v39 = vand.u32 2147483647, %v208_v21  ;;  %v153_v24 = vadd.s32 8, %v152_v17 }
  0x1b   :  { %v212_v27 = vpop.eup %211  ;;  %v92_v30 = vadd.f32 1.0, %v210_v23  ;;  %v95_v31 = vmul.f32 -0.5, %v210_v23  ;;  %v98_v43 = vand.u32 2147483647, %v210_v23  ;;  %v164_v29 = vmul.u32 128, %v152_v17 }
  0x1c   :  { %v214_v32 = vpop.eup %213  ;;  %215 = vlog2.f32 %v83_v25  ;;  %v101_v35 = vadd.f32 1.0, %v212_v27  ;;  %v87_v37 = vadd.f32 1.0, %v86_v26  ;;  %v104_v38 = vmul.f32 -0.5, %v212_v27 }
  0x1d   :  { %217 = vlog2.f32 %v92_v30  ;;  %v96_v40 = vadd.f32 1.0, %v95_v31  ;;  %v110_v41 = vadd.f32 1.0, %v214_v32  ;;  %v113_v45 = vmul.f32 -0.5, %v214_v32 }
  0x1e   :  { %219 = vlog2.f32 %v101_v35  ;;  %v105_v44 = vadd.f32 1.0, %v104_v38  ;;  %v107_v48 = vand.u32 2147483647, %v212_v27  ;;  %v88_v51 = vmul.f32 %v208_v21, %v87_v37 }
  0x1f   :  { %221 = vlog2.f32 %v110_v41  ;;  %v114_v52 = vadd.f32 1.0, %v113_v45  ;;  %vm355_vm0 = vcmp.lt.f32.partialorder %v89_v39, 0.0004427343  ;;  %v97_v56 = vmul.f32 %v210_v23, %v96_v40 }
  0x20   :  { %v116_v57 = vand.u32 2147483647, %v214_v32  ;;  %vm359_vm1 = vcmp.lt.f32.partialorder %v98_v43, 0.0004427343  ;;  %v106_v62 = vmul.f32 %v212_v27, %v105_v44  ;;  %vm108_vm2 = vcmp.lt.f32.partialorder %v107_v48, 0.0004427343 }
  0x21   :  { %v115_v4 = vmul.f32 %v214_v32, %v114_v52  ;;  %v154_v26 = vadd.s32 16, %v152_v17  ;;  %v155_v27 = vadd.s32 24, %v152_v17  ;;  %v165_v30 = vmul.u32 128, %v153_v24 }
  0x22   :  { %v216_v53 = vpop.eup %215  ;;  %vm117_vm3 = vcmp.lt.f32.partialorder %v116_v57, 0.0004427343  ;;  %v168_v38 = vadd.s32 %v164_v29, %v157_v28 }
  0x23   :  { %v218_v58 = vpop.eup %217  ;;  %v85_v60 = vmul.f32 0.6931472, %v216_v53  ;;  %v166_v32 = vmul.u32 128, %v154_v26  ;;  %v167_v37 = vmul.u32 128, %v155_v27  ;;  %v169_v41 = vadd.s32 %v165_v30, %v157_v28 }
  0x24   :  { %v220_v63 = vpop.eup %219  ;;  %v94_v1 = vmul.f32 0.6931472, %v218_v58  ;;  %vm172_vm4 = vcmp.lt.s32.totalorder %v168_v38, 128 }
  0x25   :  { %v91_v2 = vsel %vm355_vm0, %v88_v51, %v85_v60  ;;  %v103_v3 = vmul.f32 0.6931472, %v220_v63  ;;  %v222_v6 = vpop.eup %221  ;;  %v170_v44 = vadd.s32 %v166_v32, %v157_v28  ;;  %v171_v49 = vadd.s32 %v167_v37, %v157_v28 }
  0x26   :  { %v100_v8 = vsel %vm359_vm1, %v97_v56, %v94_v1  ;;  %v119_v9 = vadd.f32 %v91_v2, %v63_v54  ;;  %v112_v11 = vmul.f32 0.6931472, %v222_v6  ;;  %vm173_vm5 = vcmp.lt.s32.totalorder %v169_v41, 128 }
  0x27   :  { %v109_v10 = vsel %vm108_vm2, %v106_v62, %v103_v3  ;;  %v120_v12 = vadd.f32 %v100_v8, %v64_v59  ;;  %vm174_vm6 = vcmp.lt.s32.totalorder %v170_v44, 128  ;;  %vm175_vm7 = vcmp.lt.s32.totalorder %v171_v49, 128 }
  0x28   :  { %v121_v13 = vadd.f32 %v109_v10, %v65_v0  ;;  %v123_v14 = vsub.f32 0.0, %v119_v9  ;;  %v118_v15 = vsel %vm117_vm3, %v115_v4, %v112_v11 }
  0x29   :  { %v124_v16 = vsub.f32 0.0, %v120_v12  ;;  %v122_v18 = vadd.f32 %v118_v15, %v66_v7 }
  0x2a   :  { %v125_v19 = vsub.f32 0.0, %v121_v13  ;;  %v127_v20 = vmul.f32 1.442695, %v123_v14 }
  0x2b   :  { %v129_v21 = vmul.f32 1.442695, %v124_v16  ;;  %v126_v22 = vsub.f32 0.0, %v122_v18 }
  0x2c   :  { %223 = vpow2.f32 %v127_v20  ;;  %v131_v23 = vmul.f32 1.442695, %v125_v19 }
  0x2d   :  { %225 = vpow2.f32 %v129_v21  ;;  %v133_v25 = vmul.f32 1.442695, %v126_v22 }
  0x2e   :  { %227 = vpow2.f32 %v131_v23 }
  0x2f   :  { %229 = vpow2.f32 %v133_v25 }
  0x32   :  { %v224_v31 = vpop.eup %223 }
  0x33   :  { %v226_v33 = vpop.eup %225  ;;  %v135_v34 = vsub.f32 1.0, %v224_v31 }
  0x34   :  { %v228_v35 = vpop.eup %227  ;;  %v136_v36 = vsub.f32 1.0, %v226_v33 }
  0x35   :  { %v137_v39 = vsub.f32 1.0, %v228_v35  ;;  %v139_v40 = vmul.f32 %v135_v34, %v135_v34  ;;  %v230_v42 = vpop.eup %229 }
  0x36   :  { %v140_v43 = vmul.f32 %v136_v36, %v136_v36  ;;  %v138_v45 = vsub.f32 1.0, %v230_v42 }
  0x37   :  { %v141_v46 = vmul.f32 %v137_v39, %v137_v39  ;;  %v143_v47 = vmul.f32 0.25, %v139_v40 }
  0x38   :  { %v144_v48 = vmul.f32 0.25, %v140_v43  ;;  %v142_v50 = vmul.f32 %v138_v45, %v138_v45 }
  0x39   :  { %v145_v51 = vmul.f32 0.25, %v141_v46  ;;  %v147_v52 = vmul.f32 %v143_v47, %v119_v9 }
  0x3a   :  { %v148_v53 = vmul.f32 %v144_v48, %v120_v12  ;;  %v146_v54 = vmul.f32 0.25, %v142_v50 }
  0x3b   :  { %v149_v55 = vmul.f32 %v145_v51, %v121_v13  ;;  %v176_v56 = vsel %vm172_vm4, %v147_v52, 0.0 }
  0x3c   :  { %v177_v57 = vsel %vm173_vm5, %v148_v53, 0.0  ;;  %v150_v58 = vmul.f32 %v146_v54, %v122_v18 }
  0x3d   :  { %v178_v59 = vsel %vm174_vm6, %v149_v55, 0.0  ;;  %v180_v60 = vadd.f32 %v177_v57, %v176_v56 }
  0x3e   :  { %v179_v61 = vsel %vm175_vm7, %v150_v58, 0.0 }
  0x3f   :  { %v181_v62 = vadd.f32 %v180_v60, %v178_v59 }
  0x41   :  { %v182_v63 = vadd.f32 %v181_v62, %v179_v61 }
  0x43   :  { %183 = vst [vmem:[#allocation7] sm:$0xff] %v182_v63 }
  0x44   :  { %194 = dma.vmem_to_hbm [thread:$0]  %s190_s1, 128, %s192_s23, [#allocation4]  }
  0x45   :  { %307 = dma.done.wait [#allocation4], 128  }
  0x46   :  { %308 = vsyncadd [#allocation4], 4294967168 }
  0x47   :  { %199 = vsyncpa [#allocation3], 1 }
  0x48   :  { %200 = vsyncpa [#allocation6], 1 }
  0x49   :  { %201 = vsyncpa [#allocation4], 1 }

</bundles_post_ra>
